<compile_context>
chip_gen: v6e
topology: v6e:2x2x1
jax: 0.10.0
libtpu: 0.0.40
codegen_flags: <defaults>
</compile_context>

<pallas_src>
import functools

import jax
import jax.numpy as jnp
from jax.experimental import pallas as pl
from jax.experimental.pallas import tpu as pltpu

LANES = 128
INNER_ROWS = 1024                      # rows per in-kernel compute chunk (bounds f32 temps)
MAX_TILE_BYTES = 4 * 1024 * 1024       # per-input HBM block target (8192 rows f32, 16384 bf16)
VMEM_LIMIT_BYTES = 48 * 1024 * 1024    # 2 inputs x 2 buffers x 4 MiB + temps, with headroom


def _cdiv(a, b):
    return -(-a // b)


def _num_tensorcores():
    """Best-effort TensorCore count for the leading 'parallel' grid axis (v7x: 2)."""
    try:
        info = pltpu.get_tpu_info()
        for name in ("num_tensorcores", "tensorcores_per_chip", "tensor_cores_per_chip",
                     "num_cores_per_chip", "cores_per_chip"):
            v = getattr(info, name, None)
            if isinstance(v, int) and v >= 1:
                return min(int(v), 2)
    except Exception:
        pass
    try:
        kind = jax.devices()[0].device_kind.lower()
        if "v7" in kind or "7x" in kind:
            return 2
    except Exception:
        pass
    return 1


def _tile_partials(pred, gt):
    """Fused focal-loss partial sums for one f32 chunk of shape (rows, LANES).

    Single log per element and a shared squared factor; the pos_f / neg_f multiplies
    keep the pred=0.5 / gt=2.0 padding convention exactly neutral (contribution 0,
    log argument finite).  Returns per-lane (1, LANES) partial sums of
    (pos_loss + neg_loss) and of the positive-indicator count.
    """
    pos = gt == 1.0
    pos_f = pos.astype(jnp.float32)
    neg_f = (gt < 1.0).astype(jnp.float32)
    omp = 1.0 - pred
    omg = 1.0 - gt
    nw = omg * omg
    nw = nw * nw                               # (1 - gt)^4
    lg = jnp.log(jnp.where(pos, pred, omp))    # log(pred) for pos, log(1-pred) for neg
    sq = jnp.where(pos, omp, pred)             # (1-pred) for pos, pred for neg
    w = pos_f + nw * neg_f                     # 1 | (1-gt)^4 | 0 (padding / out-of-range)
    loss = lg * (sq * sq) * w
    return (jnp.sum(loss, axis=0, keepdims=True),
            jnp.sum(pos_f, axis=0, keepdims=True))


def _focal_loss_kernel(pred_ref, gt_ref, out_ref, *,
                       tiles_per_chunk, tile_rows, inner_rows,
                       valid_rows, needs_mask):
    p = pl.program_id(0)   # parallel chunk (one per TensorCore on megacore parts)
    i = pl.program_id(1)   # sequential tile within the chunk

    @pl.when(i == 0)
    def _init():
        out_ref[...] = jnp.zeros_like(out_ref)

    row0 = (p * tiles_per_chunk + i) * tile_rows
    num_inner = tile_rows // inner_rows   # wrapper guarantees exact division

    def block_partials(masked):
        def chunk(j, carry):
            loss_acc, pos_acc = carry
            if num_inner == 1:
                r = 0
                pred = pred_ref[...]
                gt = gt_ref[...]
            else:
                r = pl.multiple_of(j * inner_rows, inner_rows)
                pred = pred_ref[pl.ds(r, inner_rows), :]
                gt = gt_ref[pl.ds(r, inner_rows), :]
            pred = pred.astype(jnp.float32)
            gt = gt.astype(jnp.float32)
            if masked:
                # Neutralize rows past the true extent *before* the math so ragged /
                # spill-over blocks (which may contain stale VMEM data) contribute 0
                # and keep the log argument finite.
                rid = row0 + r + jax.lax.broadcasted_iota(
                    jnp.int32, (inner_rows, LANES), 0)
                ok = rid < valid_rows
                pred = jnp.where(ok, pred, 0.5)
                gt = jnp.where(ok, gt, 2.0)
            l, c = _tile_partials(pred, gt)
            return loss_acc + l, pos_acc + c

        init = (jnp.zeros((1, LANES), jnp.float32),
                jnp.zeros((1, LANES), jnp.float32))
        if num_inner == 1:
            return chunk(0, init)
        return jax.lax.fori_loop(0, num_inner, chunk, init)

    def accumulate(masked):
        l, c = block_partials(masked)
        out_ref[0:1, :] += l
        out_ref[1:2, :] += c

    if not needs_mask:
        accumulate(False)
    else:
        # Only boundary / spill-over tiles pay the iota + where mask; interior tiles
        # take the mask-free fast path.
        is_edge = row0 + tile_rows > valid_rows

        @pl.when(jnp.logical_not(is_edge))
        def _interior():
            accumulate(False)

        @pl.when(is_edge)
        def _boundary():
            accumulate(True)


@jax.jit
def focal_loss(pred, gt):
    """Pallas CornerNet focal loss. pred, gt: (batch, c, h, w), pred in (0, 1). -> f32 scalar."""
    assert pred.shape == gt.shape, (pred.shape, gt.shape)
    n = 1
    for d in pred.shape:
        n *= d

    rows = _cdiv(n, LANES)
    lane_pad = rows * LANES - n

    pred_f = jnp.reshape(pred, (-1,))
    gt_f = jnp.reshape(gt, (-1,))
    if lane_pad:
        # Pad only the (<128-element) lane tail with neutral values.
        # TODO(synk): this still copies the flat arrays once when n % 128 != 0; a true
        # zero-copy path needs an element-level mask over a 1-D layout (lane reshape
        # in-kernel is a relayout risk), so the pad is kept for that rare case.
        pred_f = jnp.concatenate([pred_f, jnp.full((lane_pad,), 0.5, pred_f.dtype)])
        gt_f = jnp.concatenate([gt_f, jnp.full((lane_pad,), 2.0, gt_f.dtype)])

    pred2d = pred_f.reshape(rows, LANES)
    gt2d = gt_f.reshape(rows, LANES)

    itemsize = jnp.dtype(pred.dtype).itemsize
    max_tile_rows = max(
        INNER_ROWS,
        (MAX_TILE_BYTES // (LANES * itemsize)) // INNER_ROWS * INNER_ROWS)

    if rows <= INNER_ROWS:
        # Small arrays: a single full-extent block, computed in one shot.
        tile_rows = rows
        inner_rows = rows
    else:
        # Large arrays: INNER_ROWS-aligned HBM blocks (last block may be ragged and is
        # masked in-kernel), processed in INNER_ROWS chunks inside the kernel.
        tile_rows = min(max_tile_rows, _cdiv(rows, INNER_ROWS) * INNER_ROWS)
        inner_rows = INNER_ROWS

    total_tiles = _cdiv(rows, tile_rows)
    num_chunks = max(1, min(_num_tensorcores(), total_tiles))
    tiles_per_chunk = _cdiv(total_tiles, num_chunks)
    needs_mask = (num_chunks * tiles_per_chunk * tile_rows) != rows

    def in_map(p, i):
        # Clamp so spill-over iterations of the last chunk re-read the last valid tile;
        # their contribution is fully masked out in-kernel (boundary branch).
        return (jnp.minimum(p * tiles_per_chunk + i, total_tiles - 1), 0)

    kernel = functools.partial(
        _focal_loss_kernel,
        tiles_per_chunk=tiles_per_chunk,
        tile_rows=tile_rows,
        inner_rows=inner_rows,
        valid_rows=rows,
        needs_mask=needs_mask,
    )

    partials = pl.pallas_call(
        kernel,
        out_shape=jax.ShapeDtypeStruct((num_chunks, 2, LANES), jnp.float32),
        grid_spec=pltpu.PrefetchScalarGridSpec(
            num_scalar_prefetch=0,
            grid=(num_chunks, tiles_per_chunk),
            in_specs=[
                pl.BlockSpec((tile_rows, LANES), in_map),
                pl.BlockSpec((tile_rows, LANES), in_map),
            ],
            # Block index is constant along the sequential axis -> the (2, 128) block
            # stays VMEM-resident and is used directly as the accumulator.
            out_specs=pl.BlockSpec((None, 2, LANES), lambda p, i: (p, 0, 0)),
        ),
        compiler_params=pltpu.CompilerParams(
            dimension_semantics=("parallel", "arbitrary"),
            vmem_limit_bytes=VMEM_LIMIT_BYTES),
    )(pred2d, gt2d)

    # Tiny finalize on (num_chunks, 2, 128) partial sums.
    sums = jnp.sum(partials, axis=(0, 2))
    loss_sum, num_pos = sums[0], sums[1]
    # When num_pos == 0 the pos part of loss_sum is 0, so -loss_sum == -neg_loss.
    return jnp.where(num_pos == 0.0, -loss_sum,
                     -loss_sum / jnp.maximum(num_pos, 1.0))


def _focal_loss_ref(pred, gt):
    pred = pred.astype(jnp.float32)
    gt = gt.astype(jnp.float32)
    pos_inds = (gt == 1.0).astype(jnp.float32)
    neg_inds = (gt < 1.0).astype(jnp.float32)
    neg_weights = (1.0 - gt) ** 4
    pos_loss = jnp.sum(jnp.log(pred) * (1.0 - pred) ** 2 * pos_inds)
    neg_loss = jnp.sum(jnp.log(1.0 - pred) * pred ** 2 * neg_weights * neg_inds)
    num_pos = jnp.sum(pos_inds)
    return jnp.where(num_pos == 0.0, -neg_loss, -(pos_loss + neg_loss) / num_pos)


if __name__ == "__main__":
    def make_inputs(key, shape, dtype, with_peaks=True):
        k1, k2, k3 = jax.random.split(key, 3)
        lo, hi = (0.01, 0.99) if dtype == jnp.bfloat16 else (1e-4, 1.0 - 1e-4)
        # pred: heatmap logits squashed into (0, 1), clipped like a CenterNet head
        pred = jax.nn.sigmoid(jax.random.normal(k1, shape, jnp.float32))
        pred = jnp.clip(pred, lo, hi).astype(dtype)
        # gt: gaussian-splatted heatmap in [0, 1) with (optionally) a few exact 1.0 peaks
        gt = jax.random.uniform(k2, shape, jnp.float32, 0.0, 0.9)
        if with_peaks:
            gt = jnp.where(jax.random.uniform(k3, shape) > 0.98, 1.0, gt)
        return pred, gt.astype(dtype)

    cases = [
        ((2, 4, 16, 16), jnp.float32, True),      # NCHW like the torch module; clean tiny tile
        ((2, 3, 5, 7), jnp.float32, True),        # lane-tail pad + tiny full-extent block
        ((2, 4, 125, 320), jnp.float32, True),    # single ragged tile -> boundary-masked path
        ((4, 8, 128, 128), jnp.bfloat16, True),   # native bf16 inputs, clean inner-chunked tile
        ((2, 30, 125, 160), jnp.float32, True),   # multi-tile grid + ragged last tile
        ((2, 4, 16, 16), jnp.float32, False),     # num_pos == 0 branch
    ]

    key = jax.random.PRNGKey(0)
    for shape, dtype, with_peaks in cases:
        key, sub = jax.random.split(key)
        pred, gt = make_inputs(sub, shape, dtype, with_peaks)
        loss = jax.block_until_ready(focal_loss(pred, gt))
        ref = jax.block_until_ready(_focal_loss_ref(pred, gt))
        assert jnp.allclose(loss, ref, rtol=1e-4, atol=1e-5), (shape, dtype, loss, ref)

    print("KERNEL_OK")
</pallas_src>

<mosaic_0001>
module attributes {stable_mosaic.version = 11 : i64} {
  func.func @_focal_loss_kernel(%arg0: i32, %arg1: i32, %arg2: memref<16x128xf32, #tpu.memory_space<vmem>>, %arg3: memref<16x128xf32, #tpu.memory_space<vmem>>, %arg4: memref<1x2x128xf32, #tpu.memory_space<vmem>>) attributes {dimension_semantics = [#tpu.dimension_semantics<parallel>, #tpu.dimension_semantics<arbitrary>], iteration_bounds = array<i64: 1, 1>, scalar_prefetch = 0 : i64, scratch_operands = 0 : i64, tpu.core_type = #tpu.core_type<tc>, window_params = [{transform_indices = @transform_0, window_bounds = array<i64: 16, 128>}, {transform_indices = @transform_1, window_bounds = array<i64: 16, 128>}, {transform_indices = @transform_2, window_bounds = array<i64: 1, 2, 128>}]} {
    %c0_i32 = arith.constant 0 : i32
    %0 = arith.cmpi eq, %arg1, %c0_i32 : i32
    %1 = arith.extui %0 : i1 to i32
    %c0_i32_0 = arith.constant 0 : i32
    %2 = arith.cmpi ne, %1, %c0_i32_0 : i32
    scf.if %2 {
      %cst_22 = arith.constant 0.000000e+00 : f32
      %47 = vector.broadcast %cst_22 : f32 to vector<2x128xf32>
      %c0_23 = arith.constant 0 : index
      %c0_24 = arith.constant 0 : index
      %c0_25 = arith.constant 0 : index
      %48 = vector.load %arg4[%c0_23, %c0_24, %c0_25] : memref<1x2x128xf32, #tpu.memory_space<vmem>>, vector<1x2x128xf32>
      %49 = vector.shape_cast %48 : vector<1x2x128xf32> to vector<2x128xf32>
      %50 = vector.shape_cast %47 : vector<2x128xf32> to vector<1x2x128xf32>
      tpu.vector_store %arg4[%c0_23, %c0_24, %c0_25], %50 {strides = array<i32>} : memref<1x2x128xf32, #tpu.memory_space<vmem>>, vector<1x2x128xf32>,
    } else {
    }
    %cst = arith.constant 0.000000e+00 : f32
    %3 = vector.broadcast %cst : f32 to vector<1x128xf32>
    %cst_1 = arith.constant 0.000000e+00 : f32
    %4 = vector.broadcast %cst_1 : f32 to vector<1x128xf32>
    %c0 = arith.constant 0 : index
    %c0_2 = arith.constant 0 : index
    %5 = vector.load %arg2[%c0, %c0_2] : memref<16x128xf32, #tpu.memory_space<vmem>>, vector<16x128xf32>
    %c0_3 = arith.constant 0 : index
    %c0_4 = arith.constant 0 : index
    %6 = vector.load %arg3[%c0_3, %c0_4] : memref<16x128xf32, #tpu.memory_space<vmem>>, vector<16x128xf32>
    %cst_5 = arith.constant 1.000000e+00 : f32
    %7 = vector.broadcast %cst_5 : f32 to vector<16x128xf32>
    %8 = arith.cmpf oeq, %6, %7 : vector<16x128xf32>
    %9 = arith.extui %8 : vector<16x128xi1> to vector<16x128xi32>
    %10 = arith.sitofp %9 : vector<16x128xi32> to vector<16x128xf32>
    %cst_6 = arith.constant 1.000000e+00 : f32
    %11 = vector.broadcast %cst_6 : f32 to vector<16x128xf32>
    %12 = arith.cmpf olt, %6, %11 : vector<16x128xf32>
    %13 = arith.extui %12 : vector<16x128xi1> to vector<16x128xi32>
    %14 = arith.sitofp %13 : vector<16x128xi32> to vector<16x128xf32>
    %cst_7 = arith.constant 1.000000e+00 : f32
    %15 = vector.broadcast %cst_7 : f32 to vector<16x128xf32>
    %16 = arith.subf %15, %5 : vector<16x128xf32>
    %cst_8 = arith.constant 1.000000e+00 : f32
    %17 = vector.broadcast %cst_8 : f32 to vector<16x128xf32>
    %18 = arith.subf %17, %6 : vector<16x128xf32>
    %19 = arith.mulf %18, %18 : vector<16x128xf32>
    %20 = arith.mulf %19, %19 : vector<16x128xf32>
    %21 = arith.select %8, %5, %16 : vector<16x128xi1>, vector<16x128xf32>
    %22 = math.log %21 : vector<16x128xf32>
    %23 = arith.select %8, %16, %5 : vector<16x128xi1>, vector<16x128xf32>
    %24 = arith.mulf %20, %14 : vector<16x128xf32>
    %25 = arith.addf %10, %24 : vector<16x128xf32>
    %26 = arith.mulf %23, %23 : vector<16x128xf32>
    %27 = arith.mulf %22, %26 : vector<16x128xf32>
    %28 = arith.mulf %27, %25 : vector<16x128xf32>
    %cst_9 = arith.constant dense<0.000000e+00> : vector<128xf32>
    %29 = vector.multi_reduction <add>, %28, %cst_9 [0] : vector<16x128xf32> to vector<128xf32>
    %30 = vector.shape_cast %29 : vector<128xf32> to vector<1x128xf32>
    %cst_10 = arith.constant dense<0.000000e+00> : vector<128xf32>
    %31 = vector.multi_reduction <add>, %10, %cst_10 [0] : vector<16x128xf32> to vector<128xf32>
    %32 = vector.shape_cast %31 : vector<128xf32> to vector<1x128xf32>
    %33 = arith.addf %3, %30 : vector<1x128xf32>
    %34 = arith.addf %4, %32 : vector<1x128xf32>
    %c0_11 = arith.constant 0 : index
    %c0_12 = arith.constant 0 : index
    %c0_13 = arith.constant 0 : index
    %35 = vector.load %arg4[%c0_11, %c0_12, %c0_13] : memref<1x2x128xf32, #tpu.memory_space<vmem>>, vector<1x1x128xf32>
    %36 = vector.shape_cast %35 : vector<1x1x128xf32> to vector<1x128xf32>
    %37 = arith.addf %36, %33 : vector<1x128xf32>
    %c0_14 = arith.constant 0 : index
    %c0_15 = arith.constant 0 : index
    %c0_16 = arith.constant 0 : index
    %38 = vector.load %arg4[%c0_14, %c0_15, %c0_16] : memref<1x2x128xf32, #tpu.memory_space<vmem>>, vector<1x1x128xf32>
    %39 = vector.shape_cast %38 : vector<1x1x128xf32> to vector<1x128xf32>
    %40 = vector.shape_cast %37 : vector<1x128xf32> to vector<1x1x128xf32>
    tpu.vector_store %arg4[%c0_14, %c0_15, %c0_16], %40 {strides = array<i32>} : memref<1x2x128xf32, #tpu.memory_space<vmem>>, vector<1x1x128xf32>,
    %c0_17 = arith.constant 0 : index
    %c1 = arith.constant 1 : index
    %c0_18 = arith.constant 0 : index
    %41 = vector.load %arg4[%c0_17, %c1, %c0_18] : memref<1x2x128xf32, #tpu.memory_space<vmem>>, vector<1x1x128xf32>
    %42 = vector.shape_cast %41 : vector<1x1x128xf32> to vector<1x128xf32>
    %43 = arith.addf %42, %34 : vector<1x128xf32>
    %c0_19 = arith.constant 0 : index
    %c1_20 = arith.constant 1 : index
    %c0_21 = arith.constant 0 : index
    %44 = vector.load %arg4[%c0_19, %c1_20, %c0_21] : memref<1x2x128xf32, #tpu.memory_space<vmem>>, vector<1x1x128xf32>
    %45 = vector.shape_cast %44 : vector<1x1x128xf32> to vector<1x128xf32>
    %46 = vector.shape_cast %43 : vector<1x128xf32> to vector<1x1x128xf32>
    tpu.vector_store %arg4[%c0_19, %c1_20, %c0_21], %46 {strides = array<i32>} : memref<1x2x128xf32, #tpu.memory_space<vmem>>, vector<1x1x128xf32>,
    return
  }
  func.func @transform_0(%arg0: i32, %arg1: i32) -> (i32, i32) {
    %c1_i32 = arith.constant 1 : i32
    %0 = arith.muli %arg0, %c1_i32 : i32
    %1 = arith.addi %0, %arg1 : i32
    %c0_i32 = arith.constant 0 : i32
    %2 = arith.minsi %1, %c0_i32 : i32
    %c0_i32_0 = arith.constant 0 : i32
    %c0_i32_1 = arith.constant 0 : i32
    return %2, %c0_i32_0 : i32, i32
  }
  func.func @transform_1(%arg0: i32, %arg1: i32) -> (i32, i32) {
    %c1_i32 = arith.constant 1 : i32
    %0 = arith.muli %arg0, %c1_i32 : i32
    %1 = arith.addi %0, %arg1 : i32
    %c0_i32 = arith.constant 0 : i32
    %2 = arith.minsi %1, %c0_i32 : i32
    %c0_i32_0 = arith.constant 0 : i32
    %c0_i32_1 = arith.constant 0 : i32
    return %2, %c0_i32_0 : i32, i32
  }
  func.func @transform_2(%arg0: i32, %arg1: i32) -> (i32, i32, i32) {
    %c0_i32 = arith.constant 0 : i32
    %c0_i32_0 = arith.constant 0 : i32
    %c0_i32_1 = arith.constant 0 : i32
    return %arg0, %c0_i32, %c0_i32_0 : i32, i32, i32
  }
}

</mosaic_0001>

<bundles_post_ra>
// kernel: focal_loss.1
= control target key start
LH: loop header
LB: loop body
LE: loop exit
PB: predicated region body
PF: predicated region fallthrough
CT: control target
= control target key end

     0   :  { %v169_v0 = vmov 0.0   ;;  %s218_s0 = inlined_call_operand.vmem [shape: f32[16,128], index: 0, kind: input, shape index: {}]   ;;  %s219_s1 = inlined_call_operand.vmem [shape: f32[16,128], index: 1, kind: input, shape index: {}]   ;;  %s220_s2 = inlined_call_operand.vmem [shape: f32[1,2,128], index: 2, kind: output, shape index: {}]  }
   0x1   :  { %79 = vst [vmem:[%s220_s2] sm:$0x3] %v169_v0  ;;  %v80_v1 = vld [vmem:[%s218_s0] sm:$0xff]  ;;  %v81_v2 = vld [vmem:[%s218_s0 + $0x8] sm:$0xff] }
   0x2   :  { %v82_v3 = vld [vmem:[%s219_s1] sm:$0xff]  ;;  %v83_v4 = vld [vmem:[%s219_s1 + $0x8] sm:$0xff]  ;;  %v96_v5 = vsub.f32 1.0, %v80_v1  ;;  %v97_v6 = vsub.f32 1.0, %v81_v2 }
   0x3   :  { %vm84_vm0 = vcmp.eq.f32.partialorder %v82_v3, 1.0  ;;  %vm85_vm1 = vcmp.eq.f32.partialorder %v83_v4, 1.0  ;;  %v98_v7 = vsub.f32 1.0, %v82_v3  ;;  %v99_v8 = vsub.f32 1.0, %v83_v4 }
   0x4   :  { %v104_v9 = vsel %vm84_vm0, %v80_v1, %v96_v5  ;;  %v105_v10 = vsel %vm85_vm1, %v81_v2, %v97_v6  ;;  %v160_v11 = vsel %vm84_vm0, 1.0, %v169_v0  ;;  %v161_v12 = vsel %vm85_vm1, 1.0, %v169_v0 }
   0x5   :  { %165 = vlog2.f32 %v104_v9  ;;  %v129_v13 = vadd.f32 %v161_v12, %v160_v11  ;;  %v100_v14 = vmul.f32 %v98_v7, %v98_v7  ;;  %v101_v15 = vmul.f32 %v99_v8, %v99_v8 }
   0x6   :  { %167 = vlog2.f32 %v105_v10  ;;  %vm90_vm2 = vcmp.lt.f32.partialorder %v82_v3, 1.0  ;;  %vm91_vm3 = vcmp.lt.f32.partialorder %v83_v4, 1.0  ;;  %v110_v23 = vsel %vm84_vm0, %v96_v5, %v80_v1 }
   0x7   :  { %v130_v16 = vrot.slane %v129_v13, 4  ;;  %v102_v18 = vmul.f32 %v100_v14, %v100_v14  ;;  %v162_v19 = vsel %vm90_vm2, 1.0, %v169_v0  ;;  %v103_v20 = vmul.f32 %v101_v15, %v101_v15 }
   0x8   :  { %v163_v22 = vsel %vm91_vm3, 1.0, %v169_v0  ;;  %v111_v25 = vsel %vm85_vm1, %v97_v6, %v81_v2  ;;  %v116_v29 = vmul.f32 %v110_v23, %v110_v23  ;;  %v141_v30 = vld [vmem:[%s220_s2 + $0x1] sm:$0x1]  ;;  %v138_v50 = vld [vmem:[%s220_s2] sm:$0x1] }
   0x9   :  { %v131_v17 = vadd.f32 %v130_v16, %v129_v13  ;;  %v112_v26 = vmul.f32 %v162_v19, %v102_v18  ;;  %v113_v27 = vmul.f32 %v163_v22, %v103_v20  ;;  %v117_v32 = vmul.f32 %v111_v25, %v111_v25 }
   0xb   :  { %v132_v21 = vrot.slane %v131_v17, 2  ;;  %v114_v35 = vadd.f32 %v160_v11, %v112_v26  ;;  %v115_v37 = vadd.f32 %v161_v12, %v113_v27 }
   0xd   :  { %v133_v24 = vadd.f32 %v132_v21, %v131_v17 }
   0xf   :  { %v134_v28 = vrot.slane %v133_v24, 1 }
  0x11   :  { %v135_v33 = vadd.f32 %v134_v28, %v133_v24 }
  0x12   :  { %v166_v31 = vpop.eup %165 }
  0x13   :  { %v168_v34 = vpop.eup %167  ;;  %v107_v36 = vmul.f32 0.6931472, %v166_v31  ;;  %v142_v39 = vadd.f32 %v141_v30, %v135_v33 }
  0x14   :  { %v109_v38 = vmul.f32 0.6931472, %v168_v34 }
  0x15   :  { %v118_v40 = vmul.f32 %v116_v29, %v107_v36  ;;  %143 = vst [vmem:[%s220_s2 + $0x1] sm:$0x1] %v142_v39 }
  0x16   :  { %v119_v41 = vmul.f32 %v117_v32, %v109_v38 }
  0x17   :  { %v120_v42 = vmul.f32 %v118_v40, %v114_v35 }
  0x18   :  { %v121_v43 = vmul.f32 %v119_v41, %v115_v37 }
  0x1a   :  { %v122_v44 = vadd.f32 %v121_v43, %v120_v42 }
  0x1c   :  { %v123_v45 = vrot.slane %v122_v44, 4 }
  0x1e   :  { %v124_v46 = vadd.f32 %v123_v45, %v122_v44 }
  0x20   :  { %v125_v47 = vrot.slane %v124_v46, 2 }
  0x22   :  { %v126_v48 = vadd.f32 %v125_v47, %v124_v46 }
  0x24   :  { %v127_v49 = vrot.slane %v126_v48, 1 }
  0x26   :  { %v128_v51 = vadd.f32 %v127_v49, %v126_v48 }
  0x28   :  { %v139_v52 = vadd.f32 %v138_v50, %v128_v51 }
  0x2a   :  { %140 = vst [vmem:[%s220_s2] sm:$0x1] %v139_v52 }

</bundles_post_ra>
